<compile_context>
chip_gen: v6e
topology: v6e:2x2x1
jax: 0.10.0
libtpu: 0.0.40
codegen_flags: <defaults>
</compile_context>

<pallas_src>
import functools

import jax
import jax.numpy as jnp
from jax.experimental import pallas as pl
from jax.experimental.pallas import tpu as pltpu


# ---------------------------------------------------------------------------
# Generation-aware resource policy.
# ---------------------------------------------------------------------------
def _tpu_limits():
    """Returns (scoped_vmem_limit_bytes, streamed_block_bytes)."""
    phys = 64 * 1024 * 1024                      # conservative default (v7x)
    try:
        info = pltpu.get_tpu_info()
        phys = int(getattr(info, "vmem_capacity_bytes", phys))
    except Exception:
        pass
    phys = max(32 * 1024 * 1024, min(phys, 256 * 1024 * 1024))
    # v7x: 64 MiB physical -> stay <= 48 MiB.  v5e/v6e: 128 MiB -> ~100 MiB.
    vmem_limit = max(32 * 1024 * 1024,
                     min(phys - 16 * 1024 * 1024, 100 * 1024 * 1024))
    block_bytes = (4 * 1024 * 1024 if phys >= 128 * 1024 * 1024
                   else 2 * 1024 * 1024)
    return vmem_limit, block_bytes


def _largest_divisor(n, cap):
    """Largest divisor of n that is <= cap (>= 1)."""
    cap = max(1, min(cap, n))
    for d in range(cap, 0, -1):
        if n % d == 0:
            return d
    return 1


def _pick_row_tile(R, row_cap, rmult):
    """Row tile: divisor of R that is a multiple of rmult (layout-legal) or R
    itself; the largest one fitting row_cap, else the smallest legal one."""
    legal = [d for d in range(rmult, R + 1, rmult) if R % d == 0]
    legal.append(R)
    fits = [d for d in legal if d <= row_cap]
    return max(fits) if fits else min(legal)


def _pick_col_tile(L, col_cap):
    """Column tile: multiple of 128 dividing L (lane dense) if possible,
    otherwise the full extent L (always layout-legal)."""
    if L % 128 != 0:
        return L
    legal = [d for d in range(128, L + 1, 128) if L % d == 0]
    fits = [d for d in legal if d <= col_cap]
    return max(fits) if fits else min(legal)


# ---------------------------------------------------------------------------
# Fused path: the whole tensor is read from HBM exactly once into a VMEM
# scratch, stats are computed in one sweep, and the normalized output is
# streamed back out in image chunks (writeback overlaps compute).
# ---------------------------------------------------------------------------
def _fused_kernel(x_hbm, rm_ref, rv_ref, w_ref, b_ref, o_ref,
                  xbuf, sem, scale_ref, shift_ref, *,
                  eps, n, cn, inv_m, unb_f, new_c):
    j = pl.program_id(0)

    @pl.when(j == 0)
    def _():
        # Single HBM read of the whole activation tensor into VMEM.
        cp = pltpu.make_async_copy(x_hbm, xbuf, sem)
        cp.start()
        cp.wait()

        c = rm_ref.shape[0]
        zero = jnp.zeros((c, 1), jnp.float32)

        # One sweep: per-channel sum and sum-of-squares together.
        def stats_body(i, carry):
            s, ss = carry
            xi = xbuf[i].astype(jnp.float32)                     # (C, L)
            s = s + jnp.sum(xi, axis=1, keepdims=True)
            ss = ss + jnp.sum(xi * xi, axis=1, keepdims=True)
            return s, ss

        s, ss = jax.lax.fori_loop(0, n, stats_body, (zero, zero))

        mu_b = s * inv_m
        # E[x^2] - E[x]^2 (clamped) * m/(m-1): identical formulation to the
        # streaming path so the two paths agree around the threshold.
        var_b = jnp.maximum(ss * inv_m - mu_b * mu_b, 0.0) * unb_f
        mean = new_c * mu_b + (1.0 - new_c) * rm_ref[...]
        var = jnp.maximum(new_c * var_b + (1.0 - new_c) * rv_ref[...], 0.0)
        inv = jax.lax.rsqrt(var + eps)
        scl = w_ref[...] * inv
        scale_ref[...] = scl
        shift_ref[...] = b_ref[...] - mean * scl

    scale = scale_ref[...]
    shift = shift_ref[...]

    # Normalize this chunk of images.  The output block is pipelined by the
    # BlockSpec machinery, so its HBM writeback overlaps the next chunk.
    @pl.loop(0, cn)
    def _(i):
        img = j * cn + i
        xi = xbuf[img].astype(jnp.float32)                       # (C, L)
        o_ref[i] = (xi * scale + shift).astype(o_ref.dtype)


def _vbn_fused(x, weight, bias, ref_mean, ref_var, eps, cn, vmem_limit,
               in_place):
    N, C, H, W = x.shape
    L = H * W
    x3 = x.reshape(N, C, L)                                      # free view
    cvec = lambda v: v.reshape(C, 1).astype(jnp.float32)
    m = float(N) * float(L)
    kern = functools.partial(
        _fused_kernel, eps=float(eps), n=int(N), cn=int(cn),
        inv_m=1.0 / m, unb_f=m / max(m - 1.0, 1.0), new_c=1.0 / (N + 1.0))
    out3 = pl.pallas_call(
        kern,
        out_shape=jax.ShapeDtypeStruct((N, C, L), x.dtype),
        grid=(N // cn,),
        in_specs=[pl.BlockSpec(memory_space=pl.ANY)]     # x stays in HBM
                 + [pl.BlockSpec((C, 1), lambda j: (0, 0))] * 4,
        out_specs=pl.BlockSpec((cn, C, L), lambda j: (j, 0, 0)),
        scratch_shapes=[pltpu.VMEM((N, C, L), x.dtype),  # resident copy of x
                        pltpu.SemaphoreType.DMA,
                        pltpu.VMEM((C, 1), jnp.float32),  # per-channel scale
                        pltpu.VMEM((C, 1), jnp.float32)], # per-channel shift
        input_output_aliases=({0: 0} if in_place else {}),
        compiler_params=pltpu.CompilerParams(
            dimension_semantics=("arbitrary",),
            vmem_limit_bytes=vmem_limit),
    )(x3, cvec(ref_mean), cvec(ref_var), cvec(weight), cvec(bias))
    return out3.reshape(N, C, H, W)


# ---------------------------------------------------------------------------
# Streaming two-pass path on the (N*C, H*W) row-major view.
# ---------------------------------------------------------------------------
def _row_stats_kernel(x_ref, sum_ref, sumsq_ref, *, lane_partials):
    """Per-row partial (sum, sumsq), accumulated over column tiles."""
    @pl.when(pl.program_id(1) == 0)
    def _():
        sum_ref[...] = jnp.zeros_like(sum_ref)
        sumsq_ref[...] = jnp.zeros_like(sumsq_ref)

    tr, tm = x_ref.shape
    if lane_partials:
        # Pure-VALU accumulation into lane-dense (tr, 128) partials: no
        # per-tile cross-lane XLU reduce, unmasked output stores.  The final
        # 128 -> 1 reduction happens once in the plain-JAX glue.
        s = jnp.zeros((tr, 128), jnp.float32)
        ss = jnp.zeros((tr, 128), jnp.float32)
        for k in range(tm // 128):
            xk = x_ref[:, k * 128:(k + 1) * 128].astype(jnp.float32)
            s = s + xk
            ss = ss + xk * xk
    else:
        x = x_ref[...].astype(jnp.float32)
        s = jnp.sum(x, axis=1, keepdims=True)
        ss = jnp.sum(x * x, axis=1, keepdims=True)
    sum_ref[...] += s
    sumsq_ref[...] += ss


def _scale_shift_kernel(x_ref, scale_ref, shift_ref, o_ref):
    o_ref[...] = (x_ref[...].astype(jnp.float32) * scale_ref[...]
                  + shift_ref[...]).astype(o_ref.dtype)


def _vbn_two_pass(x, weight, bias, ref_mean, ref_var, eps, block_bytes,
                  vmem_limit):
    N, C, H, W = x.shape
    L = H * W
    R = N * C
    x2 = x.reshape(R, L)                                         # free view
    itemsize = x2.dtype.itemsize
    rmult = max(8, 32 // itemsize)                 # 8 for f32, 16 for bf16

    # Column tile: lane-dense, capped so the in-kernel slab loop stays short.
    tm = _pick_col_tile(L, min(L, 2048))
    # Row tile: keep blocks near block_bytes even when tm == L (fixes the old
    # VMEM-busting fallback) and leave >= 2 row blocks when R >= 16 so the
    # 'parallel' row axis can be split across v7x's two TensorCores.
    row_cap = max(1, block_bytes // (tm * itemsize))
    if R >= 16:
        row_cap = min(row_cap, R // 2)
    tr = _pick_row_tile(R, row_cap, rmult)
    grid = (R // tr, L // tm)

    lane_partials = (tm % 128 == 0)
    P = 128 if lane_partials else 1

    # Pass 1: per-row partial reduction (row axis 'parallel', reduction last).
    sums, sumsqs = pl.pallas_call(
        functools.partial(_row_stats_kernel, lane_partials=lane_partials),
        out_shape=(jax.ShapeDtypeStruct((R, P), jnp.float32),
                   jax.ShapeDtypeStruct((R, P), jnp.float32)),
        grid=grid,
        in_specs=[pl.BlockSpec((tr, tm), lambda i, j: (i, j))],
        out_specs=(pl.BlockSpec((tr, P), lambda i, j: (i, 0)),
                   pl.BlockSpec((tr, P), lambda i, j: (i, 0))),
        compiler_params=pltpu.CompilerParams(
            dimension_semantics=("parallel", "arbitrary"),
            vmem_limit_bytes=vmem_limit),
    )(x2)

    # Tiny plain-JAX glue: fold (rows, lanes) -> channels, blend with the
    # reference buffers, and build per-row scale/shift exactly once.
    # NOTE: E[x^2]-E[x]^2 in f32; the clamp guards cancellation for very
    # large, strongly off-center batches.
    m = float(N) * float(L)
    s = jnp.sum(sums.reshape(N, C, P), axis=(0, 2))
    ss = jnp.sum(sumsqs.reshape(N, C, P), axis=(0, 2))
    mu_b = s / m
    var_b = jnp.maximum(ss / m - mu_b * mu_b, 0.0) * (m / max(m - 1.0, 1.0))
    new_c = 1.0 / (N + 1.0)
    old_c = 1.0 - new_c
    mean = new_c * mu_b + old_c * ref_mean.astype(jnp.float32)
    var = jnp.maximum(new_c * var_b + old_c * ref_var.astype(jnp.float32), 0.0)
    inv = jax.lax.rsqrt(var + eps)
    scale = weight.astype(jnp.float32) * inv
    shift = bias.astype(jnp.float32) - mean * scale
    scale_r = jnp.tile(scale, N).reshape(R, 1)     # row n*C + c -> scale[c]
    shift_r = jnp.tile(shift, N).reshape(R, 1)

    # Pass 2: pure lane-dense scale + shift stream (both axes independent).
    out2 = pl.pallas_call(
        _scale_shift_kernel,
        out_shape=jax.ShapeDtypeStruct((R, L), x.dtype),
        grid=grid,
        in_specs=[pl.BlockSpec((tr, tm), lambda i, j: (i, j)),
                  pl.BlockSpec((tr, 1), lambda i, j: (i, 0)),
                  pl.BlockSpec((tr, 1), lambda i, j: (i, 0))],
        out_specs=pl.BlockSpec((tr, tm), lambda i, j: (i, j)),
        compiler_params=pltpu.CompilerParams(
            dimension_semantics=("parallel", "parallel"),
            vmem_limit_bytes=vmem_limit),
    )(x2, scale_r, shift_r)
    return out2.reshape(N, C, H, W)


# ---------------------------------------------------------------------------
# Public entry point.
# ---------------------------------------------------------------------------
def virtual_batch_norm_2d(x, weight, bias, ref_mean, ref_var, *, eps=1e-5,
                          use_fused=None, block_bytes=None, in_place=True):
    """x: (N, C, H, W); weight/bias/ref_mean/ref_var: (C,)."""
    N, C, H, W = x.shape
    vmem_limit, default_block = _tpu_limits()
    if block_bytes is None:
        block_bytes = default_block

    L = H * W
    itemsize = x.dtype.itemsize
    tensor_bytes = N * C * L * itemsize
    img_bytes = C * L * itemsize
    # Output writeback chunk for the fused path (~2 MiB of whole images).
    cn = _largest_divisor(N, max(1, (2 * 1024 * 1024) // max(img_bytes, 1)))
    fused_need = (tensor_bytes                    # resident copy of x
                  + 2 * cn * img_bytes            # double-buffered out chunks
                  + 4 * C * L * 4                 # f32 temporaries
                  + (4 << 20))                    # compiler headroom
    if use_fused is None:
        use_fused = fused_need <= vmem_limit

    if use_fused:
        return _vbn_fused(x, weight, bias, ref_mean, ref_var, eps, cn,
                          vmem_limit, in_place)
    return _vbn_two_pass(x, weight, bias, ref_mean, ref_var, eps,
                         block_bytes, vmem_limit)


def _reference(x, weight, bias, ref_mean, ref_var, eps=1e-5):
    """Pure-JAX reference matching the PyTorch forward (training mode)."""
    N, C, H, W = x.shape
    M = N * H * W
    mu_b = jnp.mean(x, axis=(0, 2, 3))
    var_b = jnp.sum((x - mu_b[None, :, None, None]) ** 2,
                    axis=(0, 2, 3)) / (M - 1)
    new_c = 1.0 / (N + 1)
    old_c = 1.0 - new_c
    mean = new_c * mu_b + old_c * ref_mean
    var = new_c * var_b + old_c * ref_var
    return ((x - mean[None, :, None, None])
            / jnp.sqrt(var + eps)[None, :, None, None]
            * weight[None, :, None, None] + bias[None, :, None, None])


if __name__ == "__main__":
    key = jax.random.PRNGKey(0)
    k1, k2, k3, k4 = jax.random.split(key, 4)

    # --- Small Atari-like shape: exercises the fused single-read path. ---
    N, C, H, W = 2, 4, 16, 16
    x = jax.random.normal(k1, (N, C, H, W), dtype=jnp.float32)
    # reset_parameters(): weight ~ U(0,1), bias = 0, mean buf = 0, var buf = 1.
    weight = jax.random.uniform(k2, (C,), dtype=jnp.float32)
    bias = jnp.zeros((C,), jnp.float32)
    ref_mean = jnp.zeros((C,), jnp.float32)
    ref_var = jnp.ones((C,), jnp.float32)

    want = _reference(x, weight, bias, ref_mean, ref_var)   # before donation
    out = jax.block_until_ready(
        virtual_batch_norm_2d(x, weight, bias, ref_mean, ref_var))
    assert out.shape == (N, C, H, W) and out.dtype == x.dtype
    assert jnp.allclose(out, want, rtol=2e-4, atol=2e-4), "fused path mismatch"

    # --- Forced streaming path, multi-tile grid with lane-dense partials. ---
    N2, C2, H2, W2 = 3, 8, 48, 48
    x2 = jax.random.normal(k3, (N2, C2, H2, W2), dtype=jnp.float32) * 2.0 + 0.5
    w2 = jax.random.uniform(k4, (C2,), dtype=jnp.float32)
    b2 = jnp.zeros((C2,), jnp.float32)
    rm2 = jnp.zeros((C2,), jnp.float32)
    rv2 = jnp.ones((C2,), jnp.float32)
    want2 = _reference(x2, w2, b2, rm2, rv2)
    out2 = jax.block_until_ready(
        virtual_batch_norm_2d(x2, w2, b2, rm2, rv2,
                              use_fused=False, block_bytes=64 * 1024))
    assert jnp.allclose(out2, want2, rtol=2e-4, atol=2e-4), "two-pass mismatch"

    # --- Streaming path where H*W is not a multiple of 128 (fallback). ---
    N3, C3, H3, W3 = 2, 4, 10, 10
    x3 = jax.random.normal(k1, (N3, C3, H3, W3), dtype=jnp.float32)
    w3 = jnp.ones((C3,), jnp.float32)
    b3 = jnp.zeros((C3,), jnp.float32)
    rm3 = jnp.zeros((C3,), jnp.float32)
    rv3 = jnp.ones((C3,), jnp.float32)
    want3 = _reference(x3, w3, b3, rm3, rv3)
    out3 = jax.block_until_ready(
        virtual_batch_norm_2d(x3, w3, b3, rm3, rv3, use_fused=False))
    assert jnp.allclose(out3, want3, rtol=2e-4, atol=2e-4), "fallback mismatch"

    print("KERNEL_OK")
</pallas_src>

<mosaic_0001>
module attributes {stable_mosaic.version = 11 : i64} {
  func.func @_fused_kernel(%arg0: i32, %arg1: memref<2x4x256xf32, #tpu.memory_space<any>>, %arg2: memref<4x1xf32, #tpu.memory_space<vmem>>, %arg3: memref<4x1xf32, #tpu.memory_space<vmem>>, %arg4: memref<4x1xf32, #tpu.memory_space<vmem>>, %arg5: memref<4x1xf32, #tpu.memory_space<vmem>>, %arg6: memref<2x4x256xf32, #tpu.memory_space<vmem>>, %arg7: memref<2x4x256xf32, #tpu.memory_space<vmem>>, %arg8: memref<!tpu.dma_semaphore, #tpu.memory_space<semaphore_mem>>, %arg9: memref<4x1xf32, #tpu.memory_space<vmem>>, %arg10: memref<4x1xf32, #tpu.memory_space<vmem>>) attributes {dimension_semantics = [#tpu.dimension_semantics<arbitrary>], iteration_bounds = array<i64: 1>, scalar_prefetch = 0 : i64, scratch_operands = 4 : i64, tpu.core_type = #tpu.core_type<tc>, window_params = [{}, {pipeline_mode = #tpu.pipeline_mode<synchronous>, transform_indices = @transform_1, window_bounds = array<i64: 4, 1>}, {pipeline_mode = #tpu.pipeline_mode<synchronous>, transform_indices = @transform_2, window_bounds = array<i64: 4, 1>}, {pipeline_mode = #tpu.pipeline_mode<synchronous>, transform_indices = @transform_3, window_bounds = array<i64: 4, 1>}, {pipeline_mode = #tpu.pipeline_mode<synchronous>, transform_indices = @transform_4, window_bounds = array<i64: 4, 1>}, {transform_indices = @transform_5, window_bounds = array<i64: 2, 4, 256>}]} {
    %c0_i32 = arith.constant 0 : i32
    %0 = arith.cmpi eq, %arg0, %c0_i32 : i32
    %1 = arith.extui %0 : i1 to i32
    %c0_i32_0 = arith.constant 0 : i32
    %2 = arith.cmpi ne, %1, %c0_i32_0 : i32
    scf.if %2 {
      tpu.enqueue_dma source(%arg1 : memref<2x4x256xf32, #tpu.memory_space<any>>) target(%arg7 : memref<2x4x256xf32, #tpu.memory_space<vmem>>) target_semaphore(%arg8 : memref<!tpu.dma_semaphore, #tpu.memory_space<semaphore_mem>>)
      tpu.wait_dma2 semaphore(%arg8 : memref<!tpu.dma_semaphore, #tpu.memory_space<semaphore_mem>>) src(%arg1 : memref<2x4x256xf32, #tpu.memory_space<any>>) dst(%arg7 : memref<2x4x256xf32, #tpu.memory_space<vmem>>)
      %cst = arith.constant 0.000000e+00 : f32
      %6 = vector.broadcast %cst : f32 to vector<4x1xf32>
      %c0_i32_6 = arith.constant 0 : i32
      %c2_i32_7 = arith.constant 2 : i32
      %7 = arith.addi %c0_i32_6, %c2_i32_7 : i32
      %c1_i32_8 = arith.constant 1 : i32
      %8:2 = scf.for %arg11 = %c0_i32_6 to %7 step %c1_i32_8 iter_args(%arg12 = %6, %arg13 = %6) -> (vector<4x1xf32>, vector<4x1xf32>)  : i32 {
        %43 = arith.index_cast %arg11 : i32 to index
        %c0_32 = arith.constant 0 : index
        %c0_33 = arith.constant 0 : index
        %44 = vector.load %arg7[%43, %c0_32, %c0_33] : memref<2x4x256xf32, #tpu.memory_space<vmem>>, vector<1x4x256xf32>
        %45 = vector.shape_cast %44 : vector<1x4x256xf32> to vector<4x256xf32>
        %cst_34 = arith.constant dense<0.000000e+00> : vector<4xf32>
        %46 = vector.multi_reduction <add>, %45, %cst_34 [1] : vector<4x256xf32> to vector<4xf32>
        %47 = vector.shape_cast %46 : vector<4xf32> to vector<4x1xf32>
        %48 = arith.addf %arg12, %47 : vector<4x1xf32>
        %49 = arith.mulf %45, %45 : vector<4x256xf32>
        %cst_35 = arith.constant dense<0.000000e+00> : vector<4xf32>
        %50 = vector.multi_reduction <add>, %49, %cst_35 [1] : vector<4x256xf32> to vector<4xf32>
        %51 = vector.shape_cast %50 : vector<4xf32> to vector<4x1xf32>
        %52 = arith.addf %arg13, %51 : vector<4x1xf32>
        scf.yield %48, %52 : vector<4x1xf32>, vector<4x1xf32>
      }
      %c2_i32_9 = arith.constant 2 : i32
      %cst_10 = arith.constant 0.001953125 : f32
      %9 = vector.broadcast %cst_10 : f32 to vector<4x1xf32>
      %10 = arith.mulf %8#0, %9 : vector<4x1xf32>
      %cst_11 = arith.constant 0.001953125 : f32
      %11 = vector.broadcast %cst_11 : f32 to vector<4x1xf32>
      %12 = arith.mulf %8#1, %11 : vector<4x1xf32>
      %13 = arith.mulf %10, %10 : vector<4x1xf32>
      %14 = arith.subf %12, %13 : vector<4x1xf32>
      %cst_12 = arith.constant 0.000000e+00 : f32
      %15 = vector.broadcast %cst_12 : f32 to vector<4x1xf32>
      %16 = arith.maximumf %14, %15 : vector<4x1xf32>
      %cst_13 = arith.constant 1.00195694 : f32
      %17 = vector.broadcast %cst_13 : f32 to vector<4x1xf32>
      %18 = arith.mulf %16, %17 : vector<4x1xf32>
      %cst_14 = arith.constant 0.333333343 : f32
      %19 = vector.broadcast %cst_14 : f32 to vector<4x1xf32>
      %20 = arith.mulf %19, %10 : vector<4x1xf32>
      %c0_15 = arith.constant 0 : index
      %c0_16 = arith.constant 0 : index
      %21 = vector.load %arg2[%c0_15, %c0_16] : memref<4x1xf32, #tpu.memory_space<vmem>>, vector<4x1xf32>
      %cst_17 = arith.constant 0.666666686 : f32
      %22 = vector.broadcast %cst_17 : f32 to vector<4x1xf32>
      %23 = arith.mulf %22, %21 : vector<4x1xf32>
      %24 = arith.addf %20, %23 : vector<4x1xf32>
      %cst_18 = arith.constant 0.333333343 : f32
      %25 = vector.broadcast %cst_18 : f32 to vector<4x1xf32>
      %26 = arith.mulf %25, %18 : vector<4x1xf32>
      %c0_19 = arith.constant 0 : index
      %c0_20 = arith.constant 0 : index
      %27 = vector.load %arg3[%c0_19, %c0_20] : memref<4x1xf32, #tpu.memory_space<vmem>>, vector<4x1xf32>
      %cst_21 = arith.constant 0.666666686 : f32
      %28 = vector.broadcast %cst_21 : f32 to vector<4x1xf32>
      %29 = arith.mulf %28, %27 : vector<4x1xf32>
      %30 = arith.addf %26, %29 : vector<4x1xf32>
      %cst_22 = arith.constant 0.000000e+00 : f32
      %31 = vector.broadcast %cst_22 : f32 to vector<4x1xf32>
      %32 = arith.maximumf %30, %31 : vector<4x1xf32>
      %cst_23 = arith.constant 9.99999974E-6 : f32
      %33 = vector.broadcast %cst_23 : f32 to vector<4x1xf32>
      %34 = arith.addf %32, %33 : vector<4x1xf32>
      %35 = math.rsqrt %34 : vector<4x1xf32>
      %c0_24 = arith.constant 0 : index
      %c0_25 = arith.constant 0 : index
      %36 = vector.load %arg4[%c0_24, %c0_25] : memref<4x1xf32, #tpu.memory_space<vmem>>, vector<4x1xf32>
      %37 = arith.mulf %36, %35 : vector<4x1xf32>
      %c0_26 = arith.constant 0 : index
      %c0_27 = arith.constant 0 : index
      %38 = vector.load %arg9[%c0_26, %c0_27] : memref<4x1xf32, #tpu.memory_space<vmem>>, vector<4x1xf32>
      tpu.vector_store %arg9[%c0_26, %c0_27], %37 {strides = array<i32>} : memref<4x1xf32, #tpu.memory_space<vmem>>, vector<4x1xf32>,
      %c0_28 = arith.constant 0 : index
      %c0_29 = arith.constant 0 : index
      %39 = vector.load %arg5[%c0_28, %c0_29] : memref<4x1xf32, #tpu.memory_space<vmem>>, vector<4x1xf32>
      %40 = arith.mulf %24, %37 : vector<4x1xf32>
      %41 = arith.subf %39, %40 : vector<4x1xf32>
      %c0_30 = arith.constant 0 : index
      %c0_31 = arith.constant 0 : index
      %42 = vector.load %arg10[%c0_30, %c0_31] : memref<4x1xf32, #tpu.memory_space<vmem>>, vector<4x1xf32>
      tpu.vector_store %arg10[%c0_30, %c0_31], %41 {strides = array<i32>} : memref<4x1xf32, #tpu.memory_space<vmem>>, vector<4x1xf32>,
    } else {
    }
    %c0 = arith.constant 0 : index
    %c0_1 = arith.constant 0 : index
    %3 = vector.load %arg9[%c0, %c0_1] : memref<4x1xf32, #tpu.memory_space<vmem>>, vector<4x1xf32>
    %c0_2 = arith.constant 0 : index
    %c0_3 = arith.constant 0 : index
    %4 = vector.load %arg10[%c0_2, %c0_3] : memref<4x1xf32, #tpu.memory_space<vmem>>, vector<4x1xf32>
    %c0_i32_4 = arith.constant 0 : i32
    %c2_i32 = arith.constant 2 : i32
    %5 = arith.addi %c0_i32_4, %c2_i32 : i32
    %c1_i32 = arith.constant 1 : i32
    scf.for %arg11 = %c0_i32_4 to %5 step %c1_i32  : i32 {
      %c1_i32_6 = arith.constant 1 : i32
      %6 = arith.muli %arg11, %c1_i32_6 : i32
      %c0_i32_7 = arith.constant 0 : i32
      %7 = arith.addi %c0_i32_7, %6 : i32
      %c2_i32_8 = arith.constant 2 : i32
      %8 = arith.muli %arg0, %c2_i32_8 : i32
      %9 = arith.addi %8, %7 : i32
      %10 = arith.index_cast %9 : i32 to index
      %c0_9 = arith.constant 0 : index
      %c0_10 = arith.constant 0 : index
      %11 = vector.load %arg7[%10, %c0_9, %c0_10] : memref<2x4x256xf32, #tpu.memory_space<vmem>>, vector<1x4x256xf32>
      %12 = vector.shape_cast %11 : vector<1x4x256xf32> to vector<4x256xf32>
      %13 = vector.broadcast %3 : vector<4x1xf32> to vector<4x256xf32>
      %14 = arith.mulf %12, %13 : vector<4x256xf32>
      %15 = vector.broadcast %4 : vector<4x1xf32> to vector<4x256xf32>
      %16 = arith.addf %14, %15 : vector<4x256xf32>
      %17 = arith.index_cast %7 : i32 to index
      %c0_11 = arith.constant 0 : index
      %c0_12 = arith.constant 0 : index
      %18 = vector.load %arg6[%17, %c0_11, %c0_12] : memref<2x4x256xf32, #tpu.memory_space<vmem>>, vector<1x4x256xf32>
      %19 = vector.shape_cast %18 : vector<1x4x256xf32> to vector<4x256xf32>
      %20 = vector.shape_cast %16 : vector<4x256xf32> to vector<1x4x256xf32>
      tpu.vector_store %arg6[%17, %c0_11, %c0_12], %20 {strides = array<i32>} : memref<2x4x256xf32, #tpu.memory_space<vmem>>, vector<1x4x256xf32>,
    }
    %c2_i32_5 = arith.constant 2 : i32
    return
  }
  func.func @transform_1(%arg0: i32) -> (i32, i32) {
    %c0_i32 = arith.constant 0 : i32
    %c0_i32_0 = arith.constant 0 : i32
    %c0_i32_1 = arith.constant 0 : i32
    return %c0_i32, %c0_i32_0 : i32, i32
  }
  func.func @transform_2(%arg0: i32) -> (i32, i32) {
    %c0_i32 = arith.constant 0 : i32
    %c0_i32_0 = arith.constant 0 : i32
    %c0_i32_1 = arith.constant 0 : i32
    return %c0_i32, %c0_i32_0 : i32, i32
  }
  func.func @transform_3(%arg0: i32) -> (i32, i32) {
    %c0_i32 = arith.constant 0 : i32
    %c0_i32_0 = arith.constant 0 : i32
    %c0_i32_1 = arith.constant 0 : i32
    return %c0_i32, %c0_i32_0 : i32, i32
  }
  func.func @transform_4(%arg0: i32) -> (i32, i32) {
    %c0_i32 = arith.constant 0 : i32
    %c0_i32_0 = arith.constant 0 : i32
    %c0_i32_1 = arith.constant 0 : i32
    return %c0_i32, %c0_i32_0 : i32, i32
  }
  func.func @transform_5(%arg0: i32) -> (i32, i32, i32) {
    %c0_i32 = arith.constant 0 : i32
    %c0_i32_0 = arith.constant 0 : i32
    %c0_i32_1 = arith.constant 0 : i32
    return %arg0, %c0_i32, %c0_i32_0 : i32, i32, i32
  }
}

</mosaic_0001>

<bundles_post_ra>
// kernel: tpu_custom_call.1
= control target key start
LH: loop header
LB: loop body
LE: loop exit
PB: predicated region body
PF: predicated region fallthrough
CT: control target
= control target key end

     0   :  { %10 = vsyncpa [#allocation7], 0  ;;  %s312_s18 = smov [#allocation2]   ;;  %s371_s0 = inlined_call_operand.hbm [shape: f32[2,4,256], index: 0, kind: input, shape index: {}, may-alias: {0,5}]   ;;  %s372_s1 = inlined_call_operand.vmem [shape: f32[4,1], index: 1, kind: input, shape index: {}]   ;;  %s373_s2 = inlined_call_operand.vmem [shape: f32[4,1], index: 2, kind: input, shape index: {}]   ;;  %s374_s3 = inlined_call_operand.vmem [shape: f32[4,1], index: 3, kind: input, shape index: {}]   ;;  %s375_s4 = inlined_call_operand.vmem [shape: f32[4,1], index: 4, kind: input, shape index: {}]   ;;  %s376_s5 = inlined_call_operand.hbm [shape: f32[2,4,256], index: 5, kind: output, shape index: {}, may-alias: {0,5}]  }
   0x1   :  { %s30_s19 = sshll.u32 %s312_s18, 4  ;;  %s31_s19 = int_to_ptr.vmem [resolvable:$true] %s30_s19 }
   0x2   :  { %s244_s20 = scalar_lea.vmem %s31_s19, 256  ;;  %p249_p1 = scmp.lt.s32.totalorder %s31_s19, %s31_s19 }
   0x3   :  { %p245_p0 = scmp.ne.s32.totalorder %s31_s19, %s244_s20  ;;  %p250_p2 = scmp.lt.s32.totalorder %s244_s20, %s244_s20 }
   0x5   :  { %p251_p3 = por %p250_p2, %p249_p1 }
   0x7   :  { %p252_p4 = pnand %p251_p3, %p245_p0 }
   0x9   :  { %255 = shalt.err (!%p252_p4)  }
   0xa   :  { %33 = dma.hbm_to_vmem [thread:$0]  %s371_s0, 256, %s31_s19, [#allocation3] }
   0xb   :  { %292 = dma.done.wait [#allocation3], 256 }
   0xc   :  { %293 = vsyncadd [#allocation3], 4294967040  ;;  %v296_v0 = vmov 0.0   ;;  %v300_v1 = vmov 0.0   ;;  %s351_s23 = smov 0  }
   0xd LB: > { %s191_s24 = sshll.u32 %s306_s23, 3  ;;  %vm54_vm0 = vcmask 1043456   ;;  %s44_s23 = sadd.s32 1, %s306_s23   ;;  %s306_s23 = sphi %s351_s23, %s44_s23   ;;  %v302_v1 = vphi %v300_v1, %v301_v1   ;;  %v298_v0 = vphi %v296_v0, %v297_v0  }
   0xe   : > { %s49_s25 = scalar_lea.vmem [#allocation2], %s191_s24  ;;  %p41_p5 = scmp.ge.s32.totalorder %s44_s23, 2  }
   0xf   : > { %v50_v2 = vld [vmem:[%s49_s25] sm:$0xff]  ;;  %vm90_vm1 = vcmask (%p41_p5), 3072  }
  0x10   : > { %v52_v3 = vcombine.high %v50_v2, %v50_v2  ;;  %v55_v4 = vsel %vm54_vm0, %v50_v2, 0.0  ;;  %v61_v5 = vmul.f32 %v50_v2, %v50_v2  ;;  %v82_v20 = vld [vmem:[%s373_s2] sm:$0xf] (%p41_p5) }
  0x11   :  { %v83_v23 = vmul.f32 (%p41_p5), 0.6666667, %v82_v20  ;;  %v78_v28 = vld [vmem:[%s372_s1] sm:$0xf] (%p41_p5)  ;;  %s308_s1 = smov (%p41_p5), 0  }
  0x12   : > { %v56_v6 = vsel %vm54_vm0, %v52_v3, 0.0  ;;  %v63_v7 = vcombine.high %v61_v5, %v61_v5  ;;  %v65_v8 = vsel %vm54_vm0, %v61_v5, 0.0  ;;  %v79_v30 = vmul.f32 (%p41_p5), 0.6666667, %v78_v28  ;;  %v88_v31 = vld [vmem:[%s374_s3] sm:$0xf] (%p41_p5) }
  0x13   : > { %v57_v9 = vadd.f32 %v56_v6, %v55_v4  ;;  %v92_v35 = vld [vmem:[%s375_s4] sm:$0xf] (%p41_p5) }
  0x14   : > { %v66_v10 = vsel %vm54_vm0, %v63_v7, 0.0 }
  0x15   : > { %58 = vadd.xlane.f32.xlu0 %v57_v9  ;;  %v67_v11 = vadd.f32 %v66_v10, %v65_v8 }
  0x19   : > { %68 = vadd.xlane.f32.xlu0 %v67_v11 }
  0x9e   : > { %v59_v12 = vpop.xlane.xlu0 %58 }
  0x9f   : > { %v60_v13 = vadd.f32 %v302_v1, %v59_v12  }
  0xa1   : > { %v301_v1 = vmov %v60_v13   ;;  %43 = sbr.rel (!%p41_p5) target bundleno = 13 (0xd), region = 61  ;;  %v71_v16 = vmul.f32 (%p41_p5), 0.001953125, %v60_v13 }
  0xa2   : > { %v69_v14 = vpop.xlane.xlu0 %68 }
  0xa3   : > { %v70_v15 = vadd.f32 %v298_v0, %v69_v14   ;;  %v73_v18 = vmul.f32 (%p41_p5), %v71_v16, %v71_v16  ;;  %v77_v29 = vmul.f32 (%p41_p5), 0.33333334, %v71_v16 }
  0xa5   : > { %v297_v0 = vmov %v70_v15   ;;  %v72_v17 = vmul.f32 (%p41_p5), 0.001953125, %v70_v15  ;;  %v80_v32 = vadd.f32 (%p41_p5), %v79_v30, %v77_v29 }
  0xa7   :  { %v74_v19 = vsub.f32 %v72_v17, %v73_v18 }
  0xa9   :  { %v75_v21 = vmax.f32 %v74_v19, 0.0 }
  0xab   :  { %v76_v22 = vmul.f32 1.0019569, %v75_v21 }
  0xad   :  { %v81_v24 = vmul.f32 0.33333334, %v76_v22 }
  0xaf   :  { %v84_v25 = vadd.f32 %v83_v23, %v81_v24 }
  0xb1   :  { %v85_v26 = vmax.f32 %v84_v25, 0.0 }
  0xb3   :  { %v86_v27 = vadd.f32 1e-05, %v85_v26 }
  0xb5   :  { %233 = vrsqrt.f32 %v86_v27 }
  0xc2   :  { %v234_v33 = vpop.eup %233 }
  0xc3   :  { %v89_v34 = vmul.f32 %v234_v33, %v88_v31 }
  0xc5   :  { %91 = vst.msk [vmem:[#allocation4] sm:$0xf] %vm90_vm1, %v89_v34  ;;  %v93_v36 = vmul.f32 %v89_v34, %v80_v32 }
  0xc7   :  { %v94_v37 = vsub.f32 %v92_v35, %v93_v36 }
  0xc9   :  { %95 = vst.msk [vmem:[#allocation5] sm:$0xf] %vm90_vm1, %v94_v37 }
  0xcc   :  { %v96_v38 = vld [vmem:[#allocation4] sm:$0xf] }
  0xd0   :  { %v97_v39 = vld [vmem:[#allocation5] sm:$0xf] }
  0xd1 LB: > { %v313_v40 = vmov 0   ;;  %v314_v41 = vmov 839922192   ;;  %v117_v43 = vlaneseq  ;;  %s192_s3 = sshll.u32 %s310_s1, 3  ;;  %s103_s1 = sadd.s32 1, %s310_s1   ;;  %s310_s1 = sphi %s308_s1, %s103_s1  }
  0xd2   : > { %235 = vset.pattern.permute.xlu0 %v313_v40  ;;  %v115_v42 = vunpack.c.l.s4 %v314_v41  ;;  %s108_s4 = scalar_lea.vmem [#allocation2], %s192_s3  ;;  %s138_s7 = scalar_lea.vmem [#allocation6], %s192_s3 }
  0xd3   : > { %112 = vperm.xlu0 %235, %v96_v38   ;;  %v118_v45 = vshrl.u32 %v117_v43, 7  ;;  %v109_v49 = vld [vmem:[%s108_s4] sm:$0xff]  ;;  %p100_p6 = scmp.ge.s32.totalorder %s103_s1, 2  }
  0xd4   : > { %v116_v44 = vunpack.c.0.s8 %v115_v42  ;;  %s315_s8 = smov (%p100_p6), [#allocation6]  }
  0xd5   :  { %s145_s9 = sshll.u32 (%p100_p6), %s315_s8, 4  ;;  %s146_s9 = int_to_ptr.vmem [resolvable:$true] %s145_s9 }
  0xd6   : > { %v119_v46 = vsub.s32 %v116_v44, %v118_v45  ;;  %s256_s10 = scalar_lea.vmem (%p100_p6), %s146_s9, 256  ;;  %p261_p8 = scmp.lt.s32.totalorder (%p100_p6), %s146_s9, %s146_s9 }
  0xd7   : > { %125 = vperm.xlu0 %235, %v97_v39   ;;  %p257_p7 = scmp.ne.s32.totalorder (%p100_p6), %s146_s9, %s256_s10  ;;  %p262_p9 = scmp.lt.s32.totalorder (%p100_p6), %s256_s10, %s256_s10 }
  0xd9   :  { %p263_p10 = por (%p100_p6), %p262_p9, %p261_p8 }
  0xdb   :  { %p264_p11 = pnand (%p100_p6), %p263_p10, %p257_p7 }
 0x14e   : > { %v113_v47 = vpop.permute.xlu0 %112 }
 0x14f   : > { %v120_v48 = vrot.slane %v113_v47, %v119_v46 }
 0x151   : > { %v122_v51 = vmul.f32 %v120_v48, %v109_v49 }
 0x152   : > { %v126_v50 = vpop.permute.xlu0 %125 }
 0x153   : > { %v133_v52 = vrot.slane %v126_v50, %v119_v46  ;;  %102 = sbr.rel (!%p100_p6) target bundleno = 209 (0xd1), region = 72 }
 0x155   : > { %v135_v53 = vadd.f32 %v133_v52, %v122_v51 }
 0x157   : > { %139 = vst [vmem:[%s138_s7] sm:$0xff] %v135_v53 }
 0x158   :  { %267 = shalt.err (!%p264_p11)
}
 0x159   :  { %s316_s11 = smov 128   ;;  %s317_s12 = smov 8  }
 0x15a   :  { %151 = dma.vmem_to_hbm [thread:$0]  %s146_s9, 256, %s376_s5, [#allocation7], %s316_s11, %s316_s11, %s317_s12  }
 0x15b   :  { %294 = dma.done.wait [#allocation7], 256  }
 0x15c   :  { %295 = vsyncadd [#allocation7], 4294967040 }
 0x15d   :  { %155 = vsyncpa [#allocation7], 1 }
 0x15e   :  { %156 = vsyncmov [#allocation3] }
 0x161   :  { %s157_s15 = vpop.sfrf %156 }
 0x162   :  { %p190_p12 = scmp.ne.s32.totalorder %s157_s15, 0 }
 0x164   :  { %161 = shalt.err (%p190_p12)  }

</bundles_post_ra>
